<compile_context>
chip_gen: v6e
topology: v6e:2x2x1
jax: 0.10.0
libtpu: 0.0.40
codegen_flags: <defaults>
</compile_context>

<pallas_src>
import inspect

import jax
import jax.numpy as jnp
import numpy as np
from jax.experimental import pallas as pl
from jax.experimental.pallas import tpu as pltpu

LANE = 128        # every feature dim is padded to a multiple of this
SUBLANE = 8       # f32 sublane granularity
BATCH_ALIGN = 16  # batch-tile granularity (also covers bf16 sublane packing)

# Version-gate single-buffered resident weights (instead of a broad
# try/except that would swallow unrelated lowering errors).
try:
    _HAS_BUFFERED = hasattr(pl, "Buffered") and (
        "pipeline_mode" in inspect.signature(pl.BlockSpec).parameters)
except (TypeError, ValueError):
    _HAS_BUFFERED = False


def _round_up(n, m):
    return (n + m - 1) // m * m


def _vmem_capacity_bytes():
    """Per-core VMEM capacity; conservative v7x value if the query fails."""
    try:
        cap = getattr(pltpu.get_tpu_info(), "vmem_capacity_bytes", None)
        if cap:
            return int(cap)
    except (RuntimeError, ValueError, NotImplementedError, AttributeError):
        pass
    return 64 << 20  # v7x per-TensorCore VMEM (smallest across generations)


def _choose_batch_tile(B, compute_dtype):
    """Pick (batch_tile, padded_batch).

    Large tiles amortize the ~0.35us per-grid-step overhead and fill the
    256-row MXU on v6e/v7x; batches above 256 rows are split into >= 2 tiles
    so the "parallel" batch axis can shard across TensorCores on v7x.
    """
    tb_cap = 1024 if np.dtype(compute_dtype) == np.dtype(jnp.bfloat16) else 512
    bp_min = _round_up(B, BATCH_ALIGN)
    if bp_min <= 256:
        return bp_min, bp_min              # single grid step, minimal padding
    n_tiles = max(2, -(-bp_min // tb_cap))
    tb = _round_up(-(-bp_min // n_tiles), BATCH_ALIGN)
    return tb, tb * n_tiles


def koopman_fwd_kernel(x_ref,
                       we1_ref, be1_ref, we2_ref, be2_ref,   # encoder
                       k_ref,                                # Koopman matrix
                       wd1_ref, bd1_ref, wd2_ref, bd2_ref,   # decoder
                       x_adv_ref, phi_ref, phi_adv_ref):
    cdt = we1_ref.dtype                     # MXU input dtype (f32 or bf16)
    x = x_ref[...]

    # Encoder: Linear -> ReLU -> Linear (f32 accumulation, f32 bias adds).
    h = jnp.dot(x, we1_ref[...], preferred_element_type=jnp.float32)
    h = jnp.maximum(h + be1_ref[0:1, :], 0.0).astype(cdt)
    phi = jnp.dot(h, we2_ref[...], preferred_element_type=jnp.float32)
    phi = phi + be2_ref[0:1, :]
    phi_ref[...] = phi.astype(phi_ref.dtype)

    # One step ahead in latent space: phi @ K.
    phi_adv = jnp.dot(phi.astype(cdt), k_ref[...],
                      preferred_element_type=jnp.float32)
    phi_adv_ref[...] = phi_adv.astype(phi_adv_ref.dtype)

    # Decoder: Linear -> ReLU -> Linear.
    g = jnp.dot(phi_adv.astype(cdt), wd1_ref[...],
                preferred_element_type=jnp.float32)
    g = jnp.maximum(g + bd1_ref[0:1, :], 0.0).astype(cdt)
    x_adv = jnp.dot(g, wd2_ref[...], preferred_element_type=jnp.float32)
    x_adv_ref[...] = (x_adv + bd2_ref[0:1, :]).astype(x_adv_ref.dtype)


def prepare_params(params, *, compute_dtype=jnp.float32):
    """Pad + cast the KoopmanAE parameters once (hoisted out of forward).

    compute_dtype: jnp.float32 (exact) or jnp.bfloat16 (fast MXU path on every
    TPU generation - v5e's MXU is bf16-native too; accumulation stays f32).
    Biases stay f32 since they are added to the f32 accumulator.
    Zero padding keeps the valid region exact (padded rows/cols contribute 0,
    and ReLU(0) = 0).
    """
    we1, be1, we2, be2, K, wd1, bd1, wd2, bd2 = params
    D_in, H = we1.shape
    L = we2.shape[1]
    Dp, Hp, Lp = (_round_up(d, LANE) for d in (D_in, H, L))

    def padw(a, rows, cols):
        a = a.astype(jnp.float32)
        a = jnp.pad(a, ((0, rows - a.shape[0]), (0, cols - a.shape[1])))
        return a.astype(compute_dtype)

    def padb(b, cols):
        b = jnp.pad(b.astype(jnp.float32), (0, cols - b.shape[0]))
        # Sublane-aligned (8, cols) tile; kernel reads row 0.
        return jnp.tile(b[None, :], (SUBLANE, 1))

    resident = (padw(we1, Dp, Hp), padb(be1, Hp),
                padw(we2, Hp, Lp), padb(be2, Lp),
                padw(K, Lp, Lp),
                padw(wd1, Lp, Hp), padb(bd1, Hp),
                padw(wd2, Hp, Dp), padb(bd2, Dp))
    return {"resident": resident,
            "dims": (D_in, H, L, Dp, Hp, Lp),
            "compute_dtype": compute_dtype}


def koopman_forward(x, prepared, *, out_dtype=jnp.float32, batch_tile=None):
    """Fused KoopmanAE forward.  x: (B, input_dim).

    Returns (x_advanced, phi, phi_advanced), matching the PyTorch forward().
    out_dtype may be jnp.bfloat16 to halve output-side HBM traffic when the
    consumer tolerates it.
    """
    resident = prepared["resident"]
    D_in, H, L, Dp, Hp, Lp = prepared["dims"]
    cdt = prepared["compute_dtype"]
    B = x.shape[0]
    if x.shape[1] != D_in:
        raise ValueError(f"x has {x.shape[1]} features, expected {D_in}")

    if batch_tile is None:
        tb, Bp = _choose_batch_tile(B, cdt)
    else:
        tb = int(batch_tile)
        Bp = _round_up(B, tb)
    grid = (Bp // tb,)

    xp = x.astype(jnp.float32)
    if (Bp, Dp) != (B, D_in):
        xp = jnp.pad(xp, ((0, Bp - B), (0, Dp - D_in)))
    xp = xp.astype(cdt)

    # --- VMEM budget: loud failure instead of silent capping ---
    buf_factor = 1 if _HAS_BUFFERED else 2       # residents single/double buffered
    weight_bytes = sum(a.nbytes for a in resident)
    out_itemsize = np.dtype(out_dtype).itemsize
    io_bytes = (2 * tb * Dp * np.dtype(cdt).itemsize
                + 2 * tb * (Dp + 2 * Lp) * out_itemsize)  # double-buffered tiles
    headroom = 8 << 20                                     # compiler scratch etc.
    vmem_cap = (_vmem_capacity_bytes() * 3) // 4           # ~48 MiB on v7x
    needed = buf_factor * weight_bytes + io_bytes + headroom
    if needed > vmem_cap:
        # TODO(synk): add a feature-dim (reduction) grid axis + accumulator
        # scratch so hidden dims too large for resident weights still work.
        raise ValueError(
            f"Resident weights need ~{needed >> 20} MiB VMEM but only "
            f"{vmem_cap >> 20} MiB is budgeted on this TPU generation; "
            "feature-dim tiling is not implemented.")
    vmem_limit = int(min(max(needed, 16 << 20), vmem_cap))

    # --- specs ---
    def resident_spec(shape):
        if _HAS_BUFFERED:
            # Block index never changes across the grid -> single-buffer it.
            return pl.BlockSpec(shape, lambda i: (0, 0),
                                pipeline_mode=pl.Buffered(1))
        return pl.BlockSpec(shape, lambda i: (0, 0))

    in_specs = [pl.BlockSpec((tb, Dp), lambda i: (i, 0))]     # x (batch tiled)
    in_specs += [resident_spec(a.shape) for a in resident]    # weights/biases/K

    out_specs = [pl.BlockSpec((tb, Dp), lambda i: (i, 0)),    # x_advanced
                 pl.BlockSpec((tb, Lp), lambda i: (i, 0)),    # phi
                 pl.BlockSpec((tb, Lp), lambda i: (i, 0))]    # phi_advanced
    out_shape = (jax.ShapeDtypeStruct((Bp, Dp), out_dtype),
                 jax.ShapeDtypeStruct((Bp, Lp), out_dtype),
                 jax.ShapeDtypeStruct((Bp, Lp), out_dtype))

    flops = 2 * Bp * (Dp * Hp + Hp * Lp + Lp * Lp + Lp * Hp + Hp * Dp)
    bytes_accessed = (xp.nbytes + weight_bytes
                      + Bp * (Dp + 2 * Lp) * out_itemsize)
    cost = pl.CostEstimate(flops=flops, transcendentals=0,
                           bytes_accessed=bytes_accessed)

    x_adv, phi, phi_adv = pl.pallas_call(
        koopman_fwd_kernel,
        out_shape=out_shape,
        grid_spec=pltpu.PrefetchScalarGridSpec(
            num_scalar_prefetch=0,
            grid=grid,
            in_specs=in_specs,
            out_specs=out_specs,
        ),
        compiler_params=pltpu.CompilerParams(
            dimension_semantics=("parallel",),
            vmem_limit_bytes=vmem_limit,
        ),
        cost_estimate=cost,
    )(xp, *resident)

    # Un-pad only when needed (no-op when B and the dims are already aligned).
    if Bp != B or Dp != D_in:
        x_adv = x_adv[:B, :D_in]
    if Bp != B or Lp != L:
        phi = phi[:B, :L]
        phi_adv = phi_adv[:B, :L]
    return x_adv, phi, phi_adv


def init_params(key, input_dim, linear_dims):
    """Init mirroring the PyTorch module: Linear weights (out,in) -> stored (in,out)."""
    assert len(linear_dims) == 2, "this script instantiates a 2-layer enc/dec"
    d0, d1 = linear_dims
    keys = jax.random.split(key, 8)

    def linear(kw, kb, out_dim, in_dim):
        bound = 1.0 / jnp.sqrt(in_dim)
        w = jax.random.uniform(kw, (out_dim, in_dim), jnp.float32, -bound, bound)
        b = jax.random.uniform(kb, (out_dim,), jnp.float32, -bound, bound)
        return w.T, b                                   # (in, out), (out,)

    we1, be1 = linear(keys[0], keys[1], d0, input_dim)   # encoder_1
    we2, be2 = linear(keys[2], keys[3], d1, d0)          # encoder_2
    wd1, bd1 = linear(keys[4], keys[5], d0, d1)          # decoder_1
    wd2, bd2 = linear(keys[6], keys[7], input_dim, d0)   # decoder_2
    K = jnp.eye(d1, dtype=jnp.float32)                   # Koopman operator init
    return (we1, be1, we2, be2, K, wd1, bd1, wd2, bd2)


def reference_forward(x, params):
    """Pure-JAX reference matching the PyTorch forward()."""
    we1, be1, we2, be2, K, wd1, bd1, wd2, bd2 = params
    h = jnp.maximum(x @ we1 + be1, 0.0)
    phi = h @ we2 + be2
    phi_adv = phi @ K
    g = jnp.maximum(phi_adv @ wd1 + bd1, 0.0)
    x_adv = g @ wd2 + bd2
    return x_adv, phi, phi_adv


if __name__ == "__main__":
    key = jax.random.PRNGKey(0)
    k_x, k_p, k_K, k_x2 = jax.random.split(key, 4)

    # KoopmanAE(input_dim=32, linear_dims=[64, 32]) on a batch of 16
    batch, input_dim = 16, 32
    linear_dims = [64, 32]
    latent = linear_dims[-1]

    x = jax.random.normal(k_x, (batch, input_dim), dtype=jnp.float32)
    params = init_params(k_p, input_dim, linear_dims)

    # Non-identity K so the phi @ K matmul is actually exercised.
    we1, be1, we2, be2, _, wd1, bd1, wd2, bd2 = params
    K = jnp.eye(latent, dtype=jnp.float32) + \
        0.05 * jax.random.normal(k_K, (latent, latent), dtype=jnp.float32)
    params = (we1, be1, we2, be2, K, wd1, bd1, wd2, bd2)

    x_adv_r, phi_r, phi_adv_r = reference_forward(x, params)

    # f32 path (exact on every generation).
    prep_f32 = prepare_params(params, compute_dtype=jnp.float32)
    x_adv, phi, phi_adv = koopman_forward(x, prep_f32)
    jax.block_until_ready((x_adv, phi, phi_adv))
    assert x_adv.shape == (batch, input_dim)
    assert phi.shape == (batch, latent) and phi_adv.shape == (batch, latent)
    assert jnp.allclose(x_adv, x_adv_r, atol=1e-4, rtol=1e-4)
    assert jnp.allclose(phi, phi_r, atol=1e-4, rtol=1e-4)
    assert jnp.allclose(phi_adv, phi_adv_r, atol=1e-4, rtol=1e-4)

    # bf16 MXU path (fast on v5e/v6e/v7x), f32 accumulation; loose check.
    prep_bf16 = prepare_params(params, compute_dtype=jnp.bfloat16)
    x_adv_b, phi_b, phi_adv_b = koopman_forward(x, prep_bf16)
    jax.block_until_ready((x_adv_b, phi_b, phi_adv_b))
    assert float(jnp.max(jnp.abs(x_adv_b - x_adv_r))) < 0.1
    assert float(jnp.max(jnp.abs(phi_b - phi_r))) < 0.1
    assert float(jnp.max(jnp.abs(phi_adv_b - phi_adv_r))) < 0.1

    # Multi-tile path (grid >= 2) with an unaligned batch to exercise padding,
    # the "parallel" batch axis, and the conditional un-pad slicing.
    x2 = jax.random.normal(k_x2, (24, input_dim), dtype=jnp.float32)
    x_adv2_r, phi2_r, phi_adv2_r = reference_forward(x2, params)
    x_adv2, phi2, phi_adv2 = koopman_forward(x2, prep_f32, batch_tile=16)
    jax.block_until_ready((x_adv2, phi2, phi_adv2))
    assert x_adv2.shape == (24, input_dim)
    assert jnp.allclose(x_adv2, x_adv2_r, atol=1e-4, rtol=1e-4)
    assert jnp.allclose(phi2, phi2_r, atol=1e-4, rtol=1e-4)
    assert jnp.allclose(phi_adv2, phi_adv2_r, atol=1e-4, rtol=1e-4)

    print("KERNEL_OK")
</pallas_src>

<mosaic_0001>
module attributes {stable_mosaic.version = 11 : i64} {
  func.func @koopman_fwd_kernel(%arg0: i32, %arg1: memref<16x128xf32, #tpu.memory_space<vmem>>, %arg2: memref<128x128xf32, #tpu.memory_space<vmem>>, %arg3: memref<8x128xf32, #tpu.memory_space<vmem>>, %arg4: memref<128x128xf32, #tpu.memory_space<vmem>>, %arg5: memref<8x128xf32, #tpu.memory_space<vmem>>, %arg6: memref<128x128xf32, #tpu.memory_space<vmem>>, %arg7: memref<128x128xf32, #tpu.memory_space<vmem>>, %arg8: memref<8x128xf32, #tpu.memory_space<vmem>>, %arg9: memref<128x128xf32, #tpu.memory_space<vmem>>, %arg10: memref<8x128xf32, #tpu.memory_space<vmem>>, %arg11: memref<16x128xf32, #tpu.memory_space<vmem>>, %arg12: memref<16x128xf32, #tpu.memory_space<vmem>>, %arg13: memref<16x128xf32, #tpu.memory_space<vmem>>) attributes {dimension_semantics = [#tpu.dimension_semantics<parallel>], iteration_bounds = array<i64: 1>, scalar_prefetch = 0 : i64, scratch_operands = 0 : i64, tpu.core_type = #tpu.core_type<tc>, window_params = [{transform_indices = @transform_0, window_bounds = array<i64: 16, 128>}, {pipeline_mode = #tpu.pipeline_mode<synchronous>, transform_indices = @transform_1, window_bounds = array<i64: 128, 128>}, {pipeline_mode = #tpu.pipeline_mode<synchronous>, transform_indices = @transform_2, window_bounds = array<i64: 8, 128>}, {pipeline_mode = #tpu.pipeline_mode<synchronous>, transform_indices = @transform_3, window_bounds = array<i64: 128, 128>}, {pipeline_mode = #tpu.pipeline_mode<synchronous>, transform_indices = @transform_4, window_bounds = array<i64: 8, 128>}, {pipeline_mode = #tpu.pipeline_mode<synchronous>, transform_indices = @transform_5, window_bounds = array<i64: 128, 128>}, {pipeline_mode = #tpu.pipeline_mode<synchronous>, transform_indices = @transform_6, window_bounds = array<i64: 128, 128>}, {pipeline_mode = #tpu.pipeline_mode<synchronous>, transform_indices = @transform_7, window_bounds = array<i64: 8, 128>}, {pipeline_mode = #tpu.pipeline_mode<synchronous>, transform_indices = @transform_8, window_bounds = array<i64: 128, 128>}, {pipeline_mode = #tpu.pipeline_mode<synchronous>, transform_indices = @transform_9, window_bounds = array<i64: 8, 128>}, {transform_indices = @transform_10, window_bounds = array<i64: 16, 128>}, {transform_indices = @transform_11, window_bounds = array<i64: 16, 128>}, {transform_indices = @transform_12, window_bounds = array<i64: 16, 128>}]} {
    %c0 = arith.constant 0 : index
    %c0_0 = arith.constant 0 : index
    %0 = vector.load %arg1[%c0, %c0_0] : memref<16x128xf32, #tpu.memory_space<vmem>>, vector<16x128xf32>
    %c0_1 = arith.constant 0 : index
    %c0_2 = arith.constant 0 : index
    %1 = vector.load %arg2[%c0_1, %c0_2] : memref<128x128xf32, #tpu.memory_space<vmem>>, vector<128x128xf32>
    %cst = arith.constant dense<0.000000e+00> : vector<16x128xf32>
    %2 = tpu.matmul %0, %1, %cst {dimension_numbers = #tpu.dot_dimension_numbers<[1], [0], [0], [1], [0, 0, 1, 1], [], []>} : vector<16x128xf32>, vector<128x128xf32>, vector<16x128xf32> -> vector<16x128xf32>
    %c0_3 = arith.constant 0 : index
    %c0_4 = arith.constant 0 : index
    %3 = vector.load %arg3[%c0_3, %c0_4] : memref<8x128xf32, #tpu.memory_space<vmem>>, vector<1x128xf32>
    %4 = vector.broadcast %3 : vector<1x128xf32> to vector<16x128xf32>
    %5 = arith.addf %2, %4 : vector<16x128xf32>
    %cst_5 = arith.constant 0.000000e+00 : f32
    %6 = vector.broadcast %cst_5 : f32 to vector<16x128xf32>
    %7 = arith.maximumf %5, %6 : vector<16x128xf32>
    %c0_6 = arith.constant 0 : index
    %c0_7 = arith.constant 0 : index
    %8 = vector.load %arg4[%c0_6, %c0_7] : memref<128x128xf32, #tpu.memory_space<vmem>>, vector<128x128xf32>
    %cst_8 = arith.constant dense<0.000000e+00> : vector<16x128xf32>
    %9 = tpu.matmul %7, %8, %cst_8 {dimension_numbers = #tpu.dot_dimension_numbers<[1], [0], [0], [1], [0, 0, 1, 1], [], []>} : vector<16x128xf32>, vector<128x128xf32>, vector<16x128xf32> -> vector<16x128xf32>
    %c0_9 = arith.constant 0 : index
    %c0_10 = arith.constant 0 : index
    %10 = vector.load %arg5[%c0_9, %c0_10] : memref<8x128xf32, #tpu.memory_space<vmem>>, vector<1x128xf32>
    %11 = vector.broadcast %10 : vector<1x128xf32> to vector<16x128xf32>
    %12 = arith.addf %9, %11 : vector<16x128xf32>
    %c0_11 = arith.constant 0 : index
    %c0_12 = arith.constant 0 : index
    %13 = vector.load %arg12[%c0_11, %c0_12] : memref<16x128xf32, #tpu.memory_space<vmem>>, vector<16x128xf32>
    tpu.vector_store %arg12[%c0_11, %c0_12], %12 {strides = array<i32>} : memref<16x128xf32, #tpu.memory_space<vmem>>, vector<16x128xf32>,
    %c0_13 = arith.constant 0 : index
    %c0_14 = arith.constant 0 : index
    %14 = vector.load %arg6[%c0_13, %c0_14] : memref<128x128xf32, #tpu.memory_space<vmem>>, vector<128x128xf32>
    %cst_15 = arith.constant dense<0.000000e+00> : vector<16x128xf32>
    %15 = tpu.matmul %12, %14, %cst_15 {dimension_numbers = #tpu.dot_dimension_numbers<[1], [0], [0], [1], [0, 0, 1, 1], [], []>} : vector<16x128xf32>, vector<128x128xf32>, vector<16x128xf32> -> vector<16x128xf32>
    %c0_16 = arith.constant 0 : index
    %c0_17 = arith.constant 0 : index
    %16 = vector.load %arg13[%c0_16, %c0_17] : memref<16x128xf32, #tpu.memory_space<vmem>>, vector<16x128xf32>
    tpu.vector_store %arg13[%c0_16, %c0_17], %15 {strides = array<i32>} : memref<16x128xf32, #tpu.memory_space<vmem>>, vector<16x128xf32>,
    %c0_18 = arith.constant 0 : index
    %c0_19 = arith.constant 0 : index
    %17 = vector.load %arg7[%c0_18, %c0_19] : memref<128x128xf32, #tpu.memory_space<vmem>>, vector<128x128xf32>
    %cst_20 = arith.constant dense<0.000000e+00> : vector<16x128xf32>
    %18 = tpu.matmul %15, %17, %cst_20 {dimension_numbers = #tpu.dot_dimension_numbers<[1], [0], [0], [1], [0, 0, 1, 1], [], []>} : vector<16x128xf32>, vector<128x128xf32>, vector<16x128xf32> -> vector<16x128xf32>
    %c0_21 = arith.constant 0 : index
    %c0_22 = arith.constant 0 : index
    %19 = vector.load %arg8[%c0_21, %c0_22] : memref<8x128xf32, #tpu.memory_space<vmem>>, vector<1x128xf32>
    %20 = vector.broadcast %19 : vector<1x128xf32> to vector<16x128xf32>
    %21 = arith.addf %18, %20 : vector<16x128xf32>
    %cst_23 = arith.constant 0.000000e+00 : f32
    %22 = vector.broadcast %cst_23 : f32 to vector<16x128xf32>
    %23 = arith.maximumf %21, %22 : vector<16x128xf32>
    %c0_24 = arith.constant 0 : index
    %c0_25 = arith.constant 0 : index
    %24 = vector.load %arg9[%c0_24, %c0_25] : memref<128x128xf32, #tpu.memory_space<vmem>>, vector<128x128xf32>
    %cst_26 = arith.constant dense<0.000000e+00> : vector<16x128xf32>
    %25 = tpu.matmul %23, %24, %cst_26 {dimension_numbers = #tpu.dot_dimension_numbers<[1], [0], [0], [1], [0, 0, 1, 1], [], []>} : vector<16x128xf32>, vector<128x128xf32>, vector<16x128xf32> -> vector<16x128xf32>
    %c0_27 = arith.constant 0 : index
    %c0_28 = arith.constant 0 : index
    %26 = vector.load %arg10[%c0_27, %c0_28] : memref<8x128xf32, #tpu.memory_space<vmem>>, vector<1x128xf32>
    %27 = vector.broadcast %26 : vector<1x128xf32> to vector<16x128xf32>
    %28 = arith.addf %25, %27 : vector<16x128xf32>
    %c0_29 = arith.constant 0 : index
    %c0_30 = arith.constant 0 : index
    %29 = vector.load %arg11[%c0_29, %c0_30] : memref<16x128xf32, #tpu.memory_space<vmem>>, vector<16x128xf32>
    tpu.vector_store %arg11[%c0_29, %c0_30], %28 {strides = array<i32>} : memref<16x128xf32, #tpu.memory_space<vmem>>, vector<16x128xf32>,
    return
  }
  func.func @transform_0(%arg0: i32) -> (i32, i32) {
    %c0_i32 = arith.constant 0 : i32
    %c0_i32_0 = arith.constant 0 : i32
    return %arg0, %c0_i32 : i32, i32
  }
  func.func @transform_1(%arg0: i32) -> (i32, i32) {
    %c0_i32 = arith.constant 0 : i32
    %c0_i32_0 = arith.constant 0 : i32
    %c0_i32_1 = arith.constant 0 : i32
    return %c0_i32, %c0_i32_0 : i32, i32
  }
  func.func @transform_2(%arg0: i32) -> (i32, i32) {
    %c0_i32 = arith.constant 0 : i32
    %c0_i32_0 = arith.constant 0 : i32
    %c0_i32_1 = arith.constant 0 : i32
    return %c0_i32, %c0_i32_0 : i32, i32
  }
  func.func @transform_3(%arg0: i32) -> (i32, i32) {
    %c0_i32 = arith.constant 0 : i32
    %c0_i32_0 = arith.constant 0 : i32
    %c0_i32_1 = arith.constant 0 : i32
    return %c0_i32, %c0_i32_0 : i32, i32
  }
  func.func @transform_4(%arg0: i32) -> (i32, i32) {
    %c0_i32 = arith.constant 0 : i32
    %c0_i32_0 = arith.constant 0 : i32
    %c0_i32_1 = arith.constant 0 : i32
    return %c0_i32, %c0_i32_0 : i32, i32
  }
  func.func @transform_5(%arg0: i32) -> (i32, i32) {
    %c0_i32 = arith.constant 0 : i32
    %c0_i32_0 = arith.constant 0 : i32
    %c0_i32_1 = arith.constant 0 : i32
    return %c0_i32, %c0_i32_0 : i32, i32
  }
  func.func @transform_6(%arg0: i32) -> (i32, i32) {
    %c0_i32 = arith.constant 0 : i32
    %c0_i32_0 = arith.constant 0 : i32
    %c0_i32_1 = arith.constant 0 : i32
    return %c0_i32, %c0_i32_0 : i32, i32
  }
  func.func @transform_7(%arg0: i32) -> (i32, i32) {
    %c0_i32 = arith.constant 0 : i32
    %c0_i32_0 = arith.constant 0 : i32
    %c0_i32_1 = arith.constant 0 : i32
    return %c0_i32, %c0_i32_0 : i32, i32
  }
  func.func @transform_8(%arg0: i32) -> (i32, i32) {
    %c0_i32 = arith.constant 0 : i32
    %c0_i32_0 = arith.constant 0 : i32
    %c0_i32_1 = arith.constant 0 : i32
    return %c0_i32, %c0_i32_0 : i32, i32
  }
  func.func @transform_9(%arg0: i32) -> (i32, i32) {
    %c0_i32 = arith.constant 0 : i32
    %c0_i32_0 = arith.constant 0 : i32
    %c0_i32_1 = arith.constant 0 : i32
    return %c0_i32, %c0_i32_0 : i32, i32
  }
  func.func @transform_10(%arg0: i32) -> (i32, i32) {
    %c0_i32 = arith.constant 0 : i32
    %c0_i32_0 = arith.constant 0 : i32
    return %arg0, %c0_i32 : i32, i32
  }
  func.func @transform_11(%arg0: i32) -> (i32, i32) {
    %c0_i32 = arith.constant 0 : i32
    %c0_i32_0 = arith.constant 0 : i32
    return %arg0, %c0_i32 : i32, i32
  }
  func.func @transform_12(%arg0: i32) -> (i32, i32) {
    %c0_i32 = arith.constant 0 : i32
    %c0_i32_0 = arith.constant 0 : i32
    return %arg0, %c0_i32 : i32, i32
  }
}

</mosaic_0001>

<bundles_post_ra>
// kernel: tpu_custom_call.1
= control target key start
LH: loop header
LB: loop body
LE: loop exit
PB: predicated region body
PF: predicated region fallthrough
CT: control target
= control target key end

     0   :  { %18 = vsyncpa [#allocation3], 0  ;;  %s1344_s0 = inlined_call_operand.hbm [shape: f32[16,128], index: 0, kind: input, shape index: {}]   ;;  %s1345_s1 = inlined_call_operand.hbm [shape: f32[128,128], index: 1, kind: input, shape index: {}]   ;;  %s1346_s2 = inlined_call_operand.hbm [shape: f32[8,128], index: 2, kind: input, shape index: {}]   ;;  %s1347_s3 = inlined_call_operand.hbm [shape: f32[128,128], index: 3, kind: input, shape index: {}]   ;;  %s1348_s4 = inlined_call_operand.hbm [shape: f32[8,128], index: 4, kind: input, shape index: {}]   ;;  %s1349_s5 = inlined_call_operand.hbm [shape: f32[128,128], index: 5, kind: input, shape index: {}]   ;;  %s1350_s6 = inlined_call_operand.hbm [shape: f32[128,128], index: 6, kind: input, shape index: {}]   ;;  %s1351_s7 = inlined_call_operand.vmem [shape: f32[8,128], index: 7, kind: input, shape index: {}]   ;;  %s1352_s8 = inlined_call_operand.hbm [shape: f32[128,128], index: 8, kind: input, shape index: {}]   ;;  %s1353_s9 = inlined_call_operand.vmem [shape: f32[8,128], index: 9, kind: input, shape index: {}]   ;;  %s1354_s10 = inlined_call_operand.hbm [shape: f32[16,128], index: 10, kind: output, shape index: {0}]   ;;  %s1355_s11 = inlined_call_operand.hbm [shape: f32[16,128], index: 11, kind: output, shape index: {1}]   ;;  %s1356_s12 = inlined_call_operand.hbm [shape: f32[16,128], index: 12, kind: output, shape index: {2}]  }
   0x1   :  { %19 = vsyncpa [#allocation6], 0 }
   0x2   :  { %20 = vsyncpa [#allocation9], 0 }
   0x3   :  { %21 = vsyncpa [#allocation12], 0 }
   0x4   :  { %22 = vsyncpa [#allocation15], 0 }
   0x5   :  { %23 = vsyncpa [#allocation4], 0 }
   0x6   :  { %24 = vsyncpa [#allocation18], 0  ;;  %s1200_s21 = smov [#allocation5]   ;;  %s1201_s23 = smov [#allocation8]  }
   0x7   :  { %s42_s22 = sshll.u32 %s1200_s21, 4  ;;  %s64_s24 = sshll.u32 %s1201_s23, 4  ;;  %s43_s22 = int_to_ptr.vmem [resolvable:$true] %s42_s22  ;;  %s65_s24 = int_to_ptr.vmem [resolvable:$true] %s64_s24 }
   0x8   :  { %s974_s25 = scalar_lea.vmem %s43_s22, 2048  ;;  %p979_p1 = scmp.lt.s32.totalorder %s43_s22, %s43_s22 }
   0x9   :  { %p975_p0 = scmp.ne.s32.totalorder %s43_s22, %s974_s25  ;;  %p980_p2 = scmp.lt.s32.totalorder %s974_s25, %s974_s25 }
   0xb   :  { %p981_p3 = por %p980_p2, %p979_p1 }
   0xd   :  { %p982_p4 = pnand %p981_p3, %p975_p0 }
   0xf   :  { %985 = shalt.err (!%p982_p4)
}
  0x10   :  { %s1202_s26 = smov 128   ;;  %s1203_s27 = smov 8  }
  0x11   :  { %48 = dma.hbm_to_vmem [thread:$0]  %s1345_s1, 2048, %s43_s22, [#allocation6], %s1202_s26, %s1202_s26, %s1203_s27  }
  0x12   :  { %s994_s30 = scalar_lea.vmem %s65_s24, 2048  ;;  %p999_p6 = scmp.lt.s32.totalorder %s65_s24, %s65_s24 }
  0x13   :  { %p995_p5 = scmp.ne.s32.totalorder %s65_s24, %s994_s30  ;;  %p1000_p7 = scmp.lt.s32.totalorder %s994_s30, %s994_s30 }
  0x15   :  { %p1001_p8 = por %p1000_p7, %p999_p6 }
  0x17   :  { %p1002_p9 = pnand %p1001_p8, %p995_p5 }
  0x19   :  { %1005 = shalt.err (!%p1002_p9)
}
  0x1a   :  { %70 = dma.hbm_to_vmem [thread:$0]  %s1347_s3, 2048, %s65_s24, [#allocation9], %s1202_s26, %s1202_s26, %s1203_s27  }
  0x1b   :  { %s1204_s15 = smov [#allocation11]   ;;  %s1205_s17 = smov [#allocation2]  }
  0x1c   :  { %s86_s16 = sshll.u32 %s1204_s15, 4  ;;  %s30_s18 = sshll.u32 %s1205_s17, 4  ;;  %s87_s16 = int_to_ptr.vmem [resolvable:$true] %s86_s16  ;;  %s31_s18 = int_to_ptr.vmem [resolvable:$true] %s30_s18 }
  0x1d   :  { %s1014_s1 = scalar_lea.vmem %s87_s16, 2048  ;;  %p1019_p11 = scmp.lt.s32.totalorder %s87_s16, %s87_s16 }
  0x1e   :  { %p1015_p10 = scmp.ne.s32.totalorder %s87_s16, %s1014_s1  ;;  %p1020_p12 = scmp.lt.s32.totalorder %s1014_s1, %s1014_s1 }
  0x20   :  { %p1021_p13 = por %p1020_p12, %p1019_p11 }
  0x22   :  { %p1022_p0 = pnand %p1021_p13, %p1015_p10 }
  0x24   :  { %1025 = shalt.err (!%p1022_p0)
}
  0x25   :  { %92 = dma.hbm_to_vmem [thread:$0]  %s1349_s5, 2048, %s87_s16, [#allocation12], %s1202_s26, %s1202_s26, %s1203_s27  }
  0x26   :  { %s1034_s3 = scalar_lea.vmem %s31_s18, 256  ;;  %p1039_p2 = scmp.lt.s32.totalorder %s31_s18, %s31_s18 }
  0x27   :  { %p1035_p1 = scmp.ne.s32.totalorder %s31_s18, %s1034_s3  ;;  %p1040_p3 = scmp.lt.s32.totalorder %s1034_s3, %s1034_s3 }
  0x29   :  { %p1041_p4 = por %p1040_p3, %p1039_p2 }
  0x2b   :  { %p1042_p5 = pnand %p1041_p4, %p1035_p1 }
  0x2d   :  { %1045 = shalt.err (!%p1042_p5)
}
  0x2e   :  { %36 = dma.hbm_to_vmem [thread:$0]  %s1344_s0, 256, %s31_s18, [#allocation3], %s1202_s26, %s1202_s26, %s1203_s27  }
  0x2f   :  { %s1206_s23 = smov [#allocation7]   ;;  %s1207_s25 = smov [#allocation10]  }
  0x30   :  { %s55_s24 = sshll.u32 %s1206_s23, 4  ;;  %s77_s28 = sshll.u32 %s1207_s25, 4  ;;  %s56_s24 = int_to_ptr.vmem [resolvable:$true] %s55_s24  ;;  %s78_s28 = int_to_ptr.vmem [resolvable:$true] %s77_s28 }
  0x31   :  { %s1054_s5 = scalar_lea.vmem %s56_s24, 128  ;;  %p1059_p7 = scmp.lt.s32.totalorder %s56_s24, %s56_s24 }
  0x32   :  { %p1055_p6 = scmp.ne.s32.totalorder %s56_s24, %s1054_s5  ;;  %p1060_p8 = scmp.lt.s32.totalorder %s1054_s5, %s1054_s5 }
  0x34   :  { %p1061_p9 = por %p1060_p8, %p1059_p7 }
  0x36   :  { %p1062_p10 = pnand %p1061_p9, %p1055_p6 }
  0x38   :  { %1065 = shalt.err (!%p1062_p10)
}
  0x39   :  { %58 = dma.hbm_to_vmem [thread:$0]  %s1346_s2, 128, %s56_s24, [#allocation6]  }
  0x3a   :  { %s1074_s13 = scalar_lea.vmem %s78_s28, 128  ;;  %p1079_p12 = scmp.lt.s32.totalorder %s78_s28, %s78_s28 }
  0x3b   :  { %p1075_p11 = scmp.ne.s32.totalorder %s78_s28, %s1074_s13  ;;  %p1080_p13 = scmp.lt.s32.totalorder %s1074_s13, %s1074_s13 }
  0x3d   :  { %p1081_p0 = por %p1080_p13, %p1079_p12 }
  0x3f   :  { %p1082_p1 = pnand %p1081_p0, %p1075_p11 }
  0x41   :  { %1085 = shalt.err (!%p1082_p1)
}
  0x42   :  { %80 = dma.hbm_to_vmem [thread:$0]  %s1348_s4, 128, %s78_s28, [#allocation9]  }
  0x43   :  { %s1208_s15 = smov [#allocation13]   ;;  %s1209_s17 = smov [#allocation14]  }
  0x44   :  { %s98_s16 = sshll.u32 %s1208_s15, 4  ;;  %s112_s18 = sshll.u32 %s1209_s17, 4  ;;  %s99_s16 = int_to_ptr.vmem [resolvable:$true] %s98_s16  ;;  %s113_s18 = int_to_ptr.vmem [resolvable:$true] %s112_s18 }
  0x45   :  { %s1094_s1 = scalar_lea.vmem %s99_s16, 2048  ;;  %p1099_p3 = scmp.lt.s32.totalorder %s99_s16, %s99_s16 }
  0x46   :  { %p1095_p2 = scmp.ne.s32.totalorder %s99_s16, %s1094_s1  ;;  %p1100_p4 = scmp.lt.s32.totalorder %s1094_s1, %s1094_s1 }
  0x48   :  { %p1101_p5 = por %p1100_p4, %p1099_p3 }
  0x4a   :  { %p1102_p6 = pnand %p1101_p5, %p1095_p2 }
  0x4c   :  { %1105 = shalt.err (!%p1102_p6)
}
  0x4d   :  { %104 = dma.hbm_to_vmem [thread:$0]  %s1350_s6, 2048, %s99_s16, [#allocation12], %s1202_s26, %s1202_s26, %s1203_s27  }
  0x4e   :  { %s1114_s4 = scalar_lea.vmem %s113_s18, 2048  ;;  %p1119_p8 = scmp.lt.s32.totalorder %s113_s18, %s113_s18 }
  0x4f   :  { %p1115_p7 = scmp.ne.s32.totalorder %s113_s18, %s1114_s4  ;;  %p1120_p9 = scmp.lt.s32.totalorder %s1114_s4, %s1114_s4 }
  0x51   :  { %p1121_p10 = por %p1120_p9, %p1119_p8 }
  0x53   :  { %p1122_p11 = pnand %p1121_p10, %p1115_p7 }
  0x55   :  { %1125 = shalt.err (!%p1122_p11)
}
  0x56   :  { %118 = dma.hbm_to_vmem [thread:$0]  %s1352_s8, 2048, %s113_s18, [#allocation15], %s1202_s26, %s1202_s26, %s1203_s27  }
  0x57   :  { %1186 = dma.done.wait [#allocation3], 256  }
  0x58   :  { %1187 = vsyncadd [#allocation3], 4294967040 }
  0x59   :  { %1188 = dma.done.wait [#allocation6], 2176  }
  0x5a   :  { %1189 = vsyncadd [#allocation6], 4294965120 }
  0x5b   :  { %1190 = dma.done.wait [#allocation9], 2176  }
  0x5c   :  { %1191 = vsyncadd [#allocation9], 4294965120 }
  0x5d   :  { %1192 = dma.done.wait [#allocation12], 4096  }
  0x5e   :  { %1193 = vsyncadd [#allocation12], 4294963200 }
  0x5f   :  { %1194 = dma.done.wait [#allocation15], 2048  }
  0x60   :  { %1195 = vsyncadd [#allocation15], 4294965248  ;;  %v162_v0 = vld [vmem:[#allocation5 + $0x78] sm:$0xff]  ;;  %v161_v1 = vld [vmem:[#allocation5 + $0x70] sm:$0xff]  ;;  %s1210_s21 = smov [#allocation17]  }
  0x61   :  { %778 = vmatprep.subr.mxu0 %v162_v0  ;;  %v160_v2 = vld [vmem:[#allocation5 + $0x68] sm:$0xff]  ;;  %v159_v3 = vld [vmem:[#allocation5 + $0x60] sm:$0xff]  ;;  %v145_v4 = vld [vmem:[#allocation2] sm:$0xff]  ;;  %s649_s22 = sshll.u32 %s1210_s21, 4  ;;  %s650_s22 = int_to_ptr.vmem [resolvable:$true] %s649_s22 }
  0x62   :  { %779 = vmatpush3.msra.mxu0 %v162_v0  ;;  %v158_v5 = vld [vmem:[#allocation5 + $0x58] sm:$0xff]  ;;  %810 = vmatprep.mubr.f32.mxu0 %v145_v4  ;;  %v260_v6 = vld [vmem:[#allocation8 + $0x78] sm:$0xff]  ;;  %v157_v8 = vld [vmem:[#allocation5 + $0x50] sm:$0xff]  ;;  %s1126_s23 = scalar_lea.vmem %s650_s22, 256  ;;  %p1131_p13 = scmp.lt.s32.totalorder %s650_s22, %s650_s22 }
  0x63   :  { %780 = vmatprep.subr.mxu0 %v161_v1  ;;  %v259_v7 = vld [vmem:[#allocation8 + $0x70] sm:$0xff]  ;;  %813 = vmatprep.subr.mxu1 %v260_v6  ;;  %v258_v9 = vld [vmem:[#allocation8 + $0x68] sm:$0xff]  ;;  %v156_v10 = vld [vmem:[#allocation5 + $0x48] sm:$0xff]  ;;  %p1127_p12 = scmp.ne.s32.totalorder %s650_s22, %s1126_s23  ;;  %p1132_p0 = scmp.lt.s32.totalorder %s1126_s23, %s1126_s23 }
  0x64   :  { %781 = vmatpush3.msra.mxu0 %v161_v1  ;;  %814 = vmatpush3.msra.mxu1 %v260_v6  ;;  %v257_v11 = vld [vmem:[#allocation8 + $0x60] sm:$0xff]  ;;  %v155_v12 = vld [vmem:[#allocation5 + $0x40] sm:$0xff]  ;;  %v154_v14 = vld [vmem:[#allocation5 + $0x38] sm:$0xff] }
  0x65   :  { %782 = vmatprep.subr.mxu0 %v160_v2  ;;  %815 = vmatprep.subr.mxu1 %v259_v7  ;;  %v256_v13 = vld [vmem:[#allocation8 + $0x58] sm:$0xff]  ;;  %v255_v15 = vld [vmem:[#allocation8 + $0x50] sm:$0xff]  ;;  %v153_v16 = vld [vmem:[#allocation5 + $0x30] sm:$0xff]  ;;  %p1133_p1 = por %p1132_p0, %p1131_p13 }
  0x66   :  { %783 = vmatpush3.msra.mxu0 %v160_v2  ;;  %816 = vmatpush3.msra.mxu1 %v259_v7  ;;  %v254_v17 = vld [vmem:[#allocation8 + $0x48] sm:$0xff]  ;;  %v152_v18 = vld [vmem:[#allocation5 + $0x28] sm:$0xff]  ;;  %v151_v20 = vld [vmem:[#allocation5 + $0x20] sm:$0xff] }
  0x67   :  { %784 = vmatprep.subr.mxu0 %v159_v3  ;;  %817 = vmatprep.subr.mxu1 %v258_v9  ;;  %v253_v19 = vld [vmem:[#allocation8 + $0x40] sm:$0xff]  ;;  %v252_v21 = vld [vmem:[#allocation8 + $0x38] sm:$0xff]  ;;  %v150_v22 = vld [vmem:[#allocation5 + $0x18] sm:$0xff]  ;;  %p1134_p2 = pnand %p1133_p1, %p1127_p12 }
  0x68   :  { %785 = vmatpush3.msra.mxu0 %v159_v3  ;;  %818 = vmatpush3.msra.mxu1 %v258_v9  ;;  %v251_v23 = vld [vmem:[#allocation8 + $0x30] sm:$0xff]  ;;  %v149_v24 = vld [vmem:[#allocation5 + $0x10] sm:$0xff]  ;;  %v148_v26 = vld [vmem:[#allocation5 + $0x8] sm:$0xff] }
  0x69   :  { %786 = vmatprep.subr.mxu0 %v158_v5  ;;  %819 = vmatprep.subr.mxu1 %v257_v11  ;;  %v250_v25 = vld [vmem:[#allocation8 + $0x28] sm:$0xff]  ;;  %v249_v27 = vld [vmem:[#allocation8 + $0x20] sm:$0xff]  ;;  %v147_v28 = vld [vmem:[#allocation5] sm:$0xff] }
  0x6a   :  { %787 = vmatpush3.msra.mxu0 %v158_v5  ;;  %820 = vmatpush3.msra.mxu1 %v257_v11  ;;  %v146_v29 = vld [vmem:[#allocation2 + $0x8] sm:$0xff]  ;;  %v248_v30 = vld [vmem:[#allocation8 + $0x18] sm:$0xff]  ;;  %v246_v32 = vld [vmem:[#allocation8 + $0x8] sm:$0xff] }
  0x6b   :  { %788 = vmatprep.subr.mxu0 %v157_v8  ;;  %821 = vmatprep.subr.mxu1 %v256_v13  ;;  %v247_v31 = vld [vmem:[#allocation8 + $0x10] sm:$0xff]  ;;  %v245_v33 = vld [vmem:[#allocation8] sm:$0xff]  ;;  %v357_v35 = vld [vmem:[#allocation11 + $0x70] sm:$0xff] }
  0x6c   :  { %789 = vmatpush3.msra.mxu0 %v157_v8  ;;  %822 = vmatpush3.msra.mxu1 %v256_v13  ;;  %v358_v34 = vld [vmem:[#allocation11 + $0x78] sm:$0xff]  ;;  %v356_v36 = vld [vmem:[#allocation11 + $0x68] sm:$0xff]  ;;  %v355_v37 = vld [vmem:[#allocation11 + $0x60] sm:$0xff] }
  0x6d   :  { %790 = vmatprep.subr.mxu0 %v156_v10  ;;  %823 = vmatprep.subr.mxu1 %v255_v15  ;;  %v354_v38 = vld [vmem:[#allocation11 + $0x58] sm:$0xff]  ;;  %v353_v39 = vld [vmem:[#allocation11 + $0x50] sm:$0xff]  ;;  %v352_v40 = vld [vmem:[#allocation11 + $0x48] sm:$0xff] }
  0x6e   :  { %791 = vmatpush3.msra.mxu0 %v156_v10  ;;  %824 = vmatpush3.msra.mxu1 %v255_v15  ;;  %v351_v41 = vld [vmem:[#allocation11 + $0x40] sm:$0xff]  ;;  %v350_v42 = vld [vmem:[#allocation11 + $0x38] sm:$0xff]  ;;  %v349_v43 = vld [vmem:[#allocation11 + $0x30] sm:$0xff] }
  0x6f   :  { %792 = vmatprep.subr.mxu0 %v155_v12  ;;  %825 = vmatprep.subr.mxu1 %v254_v17  ;;  %v348_v44 = vld [vmem:[#allocation11 + $0x28] sm:$0xff]  ;;  %v347_v45 = vld [vmem:[#allocation11 + $0x20] sm:$0xff]  ;;  %v346_v46 = vld [vmem:[#allocation11 + $0x18] sm:$0xff] }
  0x70   :  { %793 = vmatpush3.msra.mxu0 %v155_v12  ;;  %826 = vmatpush3.msra.mxu1 %v254_v17  ;;  %v684_v47 = vld [vmem:[#allocation7] ss:$0 sm:$0xff]  ;;  %v344_v55 = vld [vmem:[#allocation11 + $0x8] sm:$0xff]  ;;  %v343_v56 = vld [vmem:[#allocation11] sm:$0xff] }
  0x71   :  { %794 = vmatprep.subr.mxu0 %v154_v14  ;;  %827 = vmatprep.subr.mxu1 %v253_v19  ;;  %v345_v54 = vld [vmem:[#allocation11 + $0x10] sm:$0xff]  ;;  %v451_v57 = vld [vmem:[#allocation13 + $0x78] sm:$0xff]  ;;  %v449_v59 = vld [vmem:[#allocation13 + $0x68] sm:$0xff] }
  0x72   :  { %795 = vmatpush3.msra.mxu0 %v154_v14  ;;  %828 = vmatpush3.msra.mxu1 %v253_v19  ;;  %v450_v58 = vld [vmem:[#allocation13 + $0x70] sm:$0xff]  ;;  %v448_v60 = vld [vmem:[#allocation13 + $0x60] sm:$0xff]  ;;  %v447_v61 = vld [vmem:[#allocation13 + $0x58] sm:$0xff] }
  0x73   :  { %796 = vmatprep.subr.mxu0 %v153_v16  ;;  %829 = vmatprep.subr.mxu1 %v252_v21  ;;  %v446_v62 = vld [vmem:[#allocation13 + $0x50] sm:$0xff]  ;;  %v445_v63 = vld [vmem:[#allocation13 + $0x48] sm:$0xff]  ;;  %v444_v0 = vld [vmem:[#allocation13 + $0x40] sm:$0xff] }
  0x74   :  { %797 = vmatpush3.msra.mxu0 %v153_v16  ;;  %830 = vmatpush3.msra.mxu1 %v252_v21  ;;  %v443_v1 = vld [vmem:[#allocation13 + $0x38] sm:$0xff]  ;;  %v442_v2 = vld [vmem:[#allocation13 + $0x30] sm:$0xff]  ;;  %v441_v3 = vld [vmem:[#allocation13 + $0x28] sm:$0xff] }
  0x75   :  { %798 = vmatprep.subr.mxu0 %v152_v18  ;;  %831 = vmatprep.subr.mxu1 %v251_v23  ;;  %v440_v4 = vld [vmem:[#allocation13 + $0x20] sm:$0xff]  ;;  %v439_v5 = vld [vmem:[#allocation13 + $0x18] sm:$0xff]  ;;  %v438_v6 = vld [vmem:[#allocation13 + $0x10] sm:$0xff] }
  0x76   :  { %799 = vmatpush3.msra.mxu0 %v152_v18  ;;  %832 = vmatpush3.msra.mxu1 %v251_v23  ;;  %v685_v7 = vld [vmem:[#allocation10] ss:$0 sm:$0xff]  ;;  %v437_v12 = vld [vmem:[#allocation13 + $0x8] sm:$0xff]  ;;  %v436_v13 = vld [vmem:[#allocation13] sm:$0xff] }
  0x77   :  { %800 = vmatprep.subr.mxu0 %v151_v20  ;;  %833 = vmatprep.subr.mxu1 %v250_v25  ;;  %v549_v14 = vld [vmem:[#allocation14 + $0x78] sm:$0xff]  ;;  %v548_v15 = vld [vmem:[#allocation14 + $0x70] sm:$0xff]  ;;  %v547_v16 = vld [vmem:[#allocation14 + $0x68] sm:$0xff] }
  0x78   :  { %801 = vmatpush3.msra.mxu0 %v151_v20  ;;  %834 = vmatpush3.msra.mxu1 %v250_v25  ;;  %v546_v17 = vld [vmem:[#allocation14 + $0x60] sm:$0xff]  ;;  %v545_v18 = vld [vmem:[#allocation14 + $0x58] sm:$0xff]  ;;  %v544_v19 = vld [vmem:[#allocation14 + $0x50] sm:$0xff] }
  0x79   :  { %802 = vmatprep.subr.mxu0 %v150_v22  ;;  %835 = vmatprep.subr.mxu1 %v249_v27  ;;  %v543_v20 = vld [vmem:[#allocation14 + $0x48] sm:$0xff]  ;;  %v542_v21 = vld [vmem:[#allocation14 + $0x40] sm:$0xff]  ;;  %v540_v23 = vld [vmem:[#allocation14 + $0x30] sm:$0xff] }
  0x7a   :  { %803 = vmatpush3.msra.mxu0 %v150_v22  ;;  %836 = vmatpush3.msra.mxu1 %v249_v27  ;;  %v541_v22 = vld [vmem:[#allocation14 + $0x38] sm:$0xff]  ;;  %v538_v25 = vld [vmem:[#allocation14 + $0x20] sm:$0xff] }
  0x7b   :  { %804 = vmatprep.subr.mxu0 %v149_v24  ;;  %837 = vmatprep.subr.mxu1 %v248_v30 }
  0x7c   :  { %805 = vmatpush3.msra.mxu0 %v149_v24  ;;  %838 = vmatpush3.msra.mxu1 %v248_v30  ;;  %v539_v24 = vld [vmem:[#allocation14 + $0x28] sm:$0xff] }
  0x7d   :  { %806 = vmatprep.subr.mxu0 %v148_v26  ;;  %839 = vmatprep.subr.mxu1 %v247_v31  ;;  %v535_v30 = vld [vmem:[#allocation14 + $0x8] sm:$0xff] }
  0x7e   :  { %807 = vmatpush3.msra.mxu0 %v148_v26  ;;  %840 = vmatpush3.msra.mxu1 %v247_v31  ;;  %v534_v31 = vld [vmem:[#allocation14] sm:$0xff] }
  0x7f   :  { %808 = vmatprep.subr.mxu0 %v147_v28  ;;  %841 = vmatprep.subr.mxu1 %v246_v32 }
  0x80   :  { %809 = vmatpush3.msra.mxu0 %v147_v28  ;;  %842 = vmatpush3.msra.mxu1 %v246_v32  ;;  %v537_v28 = vld [vmem:[#allocation14 + $0x18] sm:$0xff]  ;;  %v686_v32 = vld [vmem:[%s1351_s7] ss:$0 sm:$0xff] }
  0x81   :  { %811 = vmatmul.mubr.f32.vlgmr.msra.gmra.mxu0 %v146_v29  ;;  %843 = vmatprep.subr.mxu1 %v245_v33  ;;  %v536_v29 = vld [vmem:[#allocation14 + $0x10] sm:$0xff] }
  0x82   :  { %844 = vmatpush3.msra.mxu1 %v245_v33  ;;  %848 = vmatprep.subr.mxu0 %v358_v34 }
  0x83   :  { %849 = vmatpush3.msra.mxu0 %v358_v34  ;;  %883 = vmatprep.subr.mxu1 %v451_v57 }
  0x84   :  { %850 = vmatprep.subr.mxu0 %v357_v35 }
  0x85   :  { %851 = vmatpush3.msra.mxu0 %v357_v35 }
  0x86   :  { %852 = vmatprep.subr.mxu0 %v356_v36 }
  0x87   :  { %853 = vmatpush3.msra.mxu0 %v356_v36 }
  0x88   :  { %854 = vmatprep.subr.mxu0 %v355_v37 }
  0x89   :  { %855 = vmatpush3.msra.mxu0 %v355_v37 }
  0x8a   :  { %856 = vmatprep.subr.mxu0 %v354_v38 }
  0x8b   :  { %857 = vmatpush3.msra.mxu0 %v354_v38 }
  0x8c   :  { %858 = vmatprep.subr.mxu0 %v353_v39 }
  0x8d   :  { %859 = vmatpush3.msra.mxu0 %v353_v39 }
  0x8e   :  { %860 = vmatprep.subr.mxu0 %v352_v40 }
  0x8f   :  { %861 = vmatpush3.msra.mxu0 %v352_v40 }
  0x90   :  { %862 = vmatprep.subr.mxu0 %v351_v41 }
  0x91   :  { %863 = vmatpush3.msra.mxu0 %v351_v41 }
  0x92   :  { %864 = vmatprep.subr.mxu0 %v350_v42 }
  0x93   :  { %865 = vmatpush3.msra.mxu0 %v350_v42 }
  0x94   :  { %866 = vmatprep.subr.mxu0 %v349_v43 }
  0x95   :  { %867 = vmatpush3.msra.mxu0 %v349_v43 }
  0x96   :  { %868 = vmatprep.subr.mxu0 %v348_v44 }
  0x97   :  { %869 = vmatpush3.msra.mxu0 %v348_v44 }
  0x98   :  { %870 = vmatprep.subr.mxu0 %v347_v45 }
  0x99   :  { %871 = vmatpush3.msra.mxu0 %v347_v45 }
  0x9a   :  { %872 = vmatprep.subr.mxu0 %v346_v46 }
  0x9b   :  { %873 = vmatpush3.msra.mxu0 %v346_v46 }
  0x9c   :  { %874 = vmatprep.subr.mxu0 %v345_v54 }
  0x9d   :  { %875 = vmatpush3.msra.mxu0 %v345_v54 }
  0x9e   :  { %876 = vmatprep.subr.mxu0 %v344_v55 }
  0x9f   :  { %877 = vmatpush3.msra.mxu0 %v344_v55 }
  0xa0   :  { %878 = vmatprep.subr.mxu0 %v343_v56 }
  0xa1   :  { %879 = vmatpush3.msra.mxu0 %v343_v56 }
  0xa2   :  { %918 = vmatprep.subr.mxu0 %v549_v14 }
 0x141   :  { %v812_v48 = vpop.f32.mrf.mxu0 }
 0x142   :  { %v240_v49 = vadd.f32 %v812_v48, %v684_v47 }
 0x143   :  { %v234_v50 = vpop.f32.mrf.mxu0 }
 0x144   :  { %v235_v51 = vadd.f32 %v684_v47, %v234_v50  ;;  %v244_v53 = vmax.f32 %v240_v49, 0.0 }
 0x146   :  { %v243_v52 = vmax.f32 %v235_v51, 0.0 }
 0x148   :  { %845 = vmatprep.mubr.f32.mxu1 %v243_v52 }
 0x149   :  { %846 = vmatmul.mubr.f32.vlgmr.msra.gmra.mxu1 %v244_v53 }
 0x14a   :  { %884 = vmatpush3.msra.mxu1 %v451_v57 }
 0x14b   :  { %885 = vmatprep.subr.mxu1 %v450_v58 }
 0x14c   :  { %886 = vmatpush3.msra.mxu1 %v450_v58 }
 0x14d   :  { %887 = vmatprep.subr.mxu1 %v449_v59 }
 0x14e   :  { %888 = vmatpush3.msra.mxu1 %v449_v59 }
 0x14f   :  { %889 = vmatprep.subr.mxu1 %v448_v60 }
 0x150   :  { %890 = vmatpush3.msra.mxu1 %v448_v60 }
 0x151   :  { %891 = vmatprep.subr.mxu1 %v447_v61 }
 0x152   :  { %892 = vmatpush3.msra.mxu1 %v447_v61 }
 0x153   :  { %893 = vmatprep.subr.mxu1 %v446_v62 }
 0x154   :  { %894 = vmatpush3.msra.mxu1 %v446_v62 }
 0x155   :  { %895 = vmatprep.subr.mxu1 %v445_v63 }
 0x156   :  { %896 = vmatpush3.msra.mxu1 %v445_v63 }
 0x157   :  { %897 = vmatprep.subr.mxu1 %v444_v0 }
 0x158   :  { %898 = vmatpush3.msra.mxu1 %v444_v0 }
 0x159   :  { %899 = vmatprep.subr.mxu1 %v443_v1 }
 0x15a   :  { %900 = vmatpush3.msra.mxu1 %v443_v1 }
 0x15b   :  { %901 = vmatprep.subr.mxu1 %v442_v2 }
 0x15c   :  { %902 = vmatpush3.msra.mxu1 %v442_v2 }
 0x15d   :  { %903 = vmatprep.subr.mxu1 %v441_v3 }
 0x15e   :  { %904 = vmatpush3.msra.mxu1 %v441_v3 }
 0x15f   :  { %905 = vmatprep.subr.mxu1 %v440_v4 }
 0x160   :  { %906 = vmatpush3.msra.mxu1 %v440_v4 }
 0x161   :  { %907 = vmatprep.subr.mxu1 %v439_v5 }
 0x162   :  { %908 = vmatpush3.msra.mxu1 %v439_v5 }
 0x163   :  { %909 = vmatprep.subr.mxu1 %v438_v6 }
 0x164   :  { %910 = vmatpush3.msra.mxu1 %v438_v6 }
 0x165   :  { %911 = vmatprep.subr.mxu1 %v437_v12 }
 0x166   :  { %912 = vmatpush3.msra.mxu1 %v437_v12 }
 0x167   :  { %913 = vmatprep.subr.mxu1 %v436_v13 }
 0x168   :  { %914 = vmatpush3.msra.mxu1 %v436_v13 }
 0x209   :  { %v847_v8 = vpop.f32.mrf.mxu1 }
 0x20a   :  { %v338_v9 = vadd.f32 %v847_v8, %v685_v7 }
 0x20b   :  { %v332_v10 = vpop.f32.mrf.mxu1 }
 0x20c   :  { %342 = vst [vmem:[#allocation17 + $0x8] sm:$0xff] %v338_v9  ;;  %v333_v11 = vadd.f32 %v685_v7, %v332_v10 }
 0x20e   :  { %341 = vst [vmem:[#allocation17] sm:$0xff] %v333_v11  ;;  %880 = vmatprep.mubr.f32.mxu0 %v333_v11 }
 0x20f   :  { %881 = vmatmul.mubr.f32.vlgmr.msra.gmra.mxu0 %v338_v9 }
 0x210   :  { %919 = vmatpush3.msra.mxu0 %v549_v14 }
 0x211   :  { %920 = vmatprep.subr.mxu0 %v548_v15 }
 0x212   :  { %921 = vmatpush3.msra.mxu0 %v548_v15 }
 0x213   :  { %922 = vmatprep.subr.mxu0 %v547_v16 }
 0x214   :  { %923 = vmatpush3.msra.mxu0 %v547_v16 }
 0x215   :  { %924 = vmatprep.subr.mxu0 %v546_v17 }
 0x216   :  { %925 = vmatpush3.msra.mxu0 %v546_v17 }
 0x217   :  { %926 = vmatprep.subr.mxu0 %v545_v18 }
 0x218   :  { %927 = vmatpush3.msra.mxu0 %v545_v18 }
 0x219   :  { %928 = vmatprep.subr.mxu0 %v544_v19 }
 0x21a   :  { %929 = vmatpush3.msra.mxu0 %v544_v19 }
 0x21b   :  { %930 = vmatprep.subr.mxu0 %v543_v20 }
 0x21c   :  { %931 = vmatpush3.msra.mxu0 %v543_v20 }
 0x21d   :  { %932 = vmatprep.subr.mxu0 %v542_v21 }
 0x21e   :  { %933 = vmatpush3.msra.mxu0 %v542_v21 }
 0x21f   :  { %934 = vmatprep.subr.mxu0 %v541_v22 }
 0x220   :  { %935 = vmatpush3.msra.mxu0 %v541_v22 }
 0x221   :  { %936 = vmatprep.subr.mxu0 %v540_v23 }
 0x222   :  { %937 = vmatpush3.msra.mxu0 %v540_v23 }
 0x223   :  { %938 = vmatprep.subr.mxu0 %v539_v24 }
 0x224   :  { %939 = vmatpush3.msra.mxu0 %v539_v24 }
 0x225   :  { %940 = vmatprep.subr.mxu0 %v538_v25 }
 0x226   :  { %941 = vmatpush3.msra.mxu0 %v538_v25 }
 0x227   :  { %942 = vmatprep.subr.mxu0 %v537_v28 }
 0x228   :  { %943 = vmatpush3.msra.mxu0 %v537_v28 }
 0x229   :  { %944 = vmatprep.subr.mxu0 %v536_v29 }
 0x22a   :  { %945 = vmatpush3.msra.mxu0 %v536_v29 }
 0x22b   :  { %946 = vmatprep.subr.mxu0 %v535_v30 }
 0x22c   :  { %947 = vmatpush3.msra.mxu0 %v535_v30 }
 0x22d   :  { %948 = vmatprep.subr.mxu0 %v534_v31 }
 0x22e   :  { %949 = vmatpush3.msra.mxu0 %v534_v31 }
 0x2cf   :  { %v882_v26 = vpop.f32.mrf.mxu0 }
 0x2d0   :  { %435 = vst [vmem:[#allocation19 + $0x8] sm:$0xff] %v882_v26 }
 0x2d1   :  { %v425_v27 = vpop.f32.mrf.mxu0 }
 0x2d2   :  { %434 = vst [vmem:[#allocation19] sm:$0xff] %v425_v27  ;;  %915 = vmatprep.mubr.f32.mxu1 %v425_v27 }
 0x2d3   :  { %916 = vmatmul.mubr.f32.vlgmr.msra.gmra.mxu1 %v882_v26 }
 0x393   :  { %v917_v33 = vpop.f32.mrf.mxu1 }
 0x394   :  { %v529_v34 = vadd.f32 %v917_v33, %v686_v32 }
 0x395   :  { %v523_v35 = vpop.f32.mrf.mxu1 }
 0x396   :  { %v524_v36 = vadd.f32 %v686_v32, %v523_v35  ;;  %v533_v38 = vmax.f32 %v529_v34, 0.0 }
 0x398   :  { %v532_v37 = vmax.f32 %v524_v36, 0.0 }
 0x39a   :  { %950 = vmatprep.mubr.f32.mxu0 %v532_v37 }
 0x39b   :  { %951 = vmatmul.mubr.f32.vlgmr.msra.gmra.mxu0 %v533_v38 }
 0x39c   :  { %1137 = shalt.err (!%p1134_p2)
}
 0x39d   :  { %655 = dma.vmem_to_hbm [thread:$0]  %s650_s22, 256, %s1355_s11, [#allocation18], %s1202_s26, %s1202_s26, %s1203_s27  }
 0x39e   :  { %s1211_s25 = smov [#allocation19]  }
 0x39f   :  { %s661_s28 = sshll.u32 %s1211_s25, 4  ;;  %s662_s28 = int_to_ptr.vmem [resolvable:$true] %s661_s28 }
 0x3a0   :  { %s1146_s5 = scalar_lea.vmem %s662_s28, 256  ;;  %p1151_p4 = scmp.lt.s32.totalorder %s662_s28, %s662_s28 }
 0x3a1   :  { %p1147_p3 = scmp.ne.s32.totalorder %s662_s28, %s1146_s5  ;;  %p1152_p5 = scmp.lt.s32.totalorder %s1146_s5, %s1146_s5 }
 0x3a3   :  { %p1153_p6 = por %p1152_p5, %p1151_p4 }
 0x3a5   :  { %p1154_p7 = pnand %p1153_p6, %p1147_p3 }
 0x3a7   :  { %1157 = shalt.err (!%p1154_p7)
}
 0x3a8   :  { %667 = dma.vmem_to_hbm [thread:$0]  %s662_s28, 256, %s1356_s12, [#allocation18], %s1202_s26, %s1202_s26, %s1203_s27  }
 0x3a9   :  { %v687_v39 = vld [vmem:[%s1353_s9] ss:$0 sm:$0xff]  ;;  %s1212_s11 = smov [#allocation16]  }
 0x3aa   :  { %s637_s14 = sshll.u32 %s1212_s11, 4  ;;  %s638_s14 = int_to_ptr.vmem [resolvable:$true] %s637_s14 }
 0x3ab   :  { %s1166_s15 = scalar_lea.vmem %s638_s14, 256  ;;  %p1171_p9 = scmp.lt.s32.totalorder %s638_s14, %s638_s14 }
 0x3ac   :  { %p1167_p8 = scmp.ne.s32.totalorder %s638_s14, %s1166_s15  ;;  %p1172_p10 = scmp.lt.s32.totalorder %s1166_s15, %s1166_s15 }
 0x3ae   :  { %p1173_p11 = por %p1172_p10, %p1171_p9 }
 0x3b0   :  { %p1174_p12 = pnand %p1173_p11, %p1167_p8 }
 0x45b   :  { %v952_v40 = vpop.f32.mrf.mxu0 }
 0x45c   :  { %v627_v41 = vadd.f32 %v952_v40, %v687_v39 }
 0x45d   :  { %v621_v42 = vpop.f32.mrf.mxu0 }
 0x45e   :  { %631 = vst [vmem:[#allocation16 + $0x8] sm:$0xff] %v627_v41  ;;  %v622_v43 = vadd.f32 %v687_v39, %v621_v42 }
 0x460   :  { %630 = vst [vmem:[#allocation16] sm:$0xff] %v622_v43 }
 0x461   :  { %1177 = shalt.err (!%p1174_p12)
}
 0x462   :  { %643 = dma.vmem_to_hbm [thread:$0]  %s638_s14, 256, %s1354_s10, [#allocation4], %s1202_s26, %s1202_s26, %s1203_s27  }
 0x463   :  { %1196 = dma.done.wait [#allocation4], 256  }
 0x464   :  { %1197 = vsyncadd [#allocation4], 4294967040 }
 0x465   :  { %1198 = dma.done.wait [#allocation18], 512  }
 0x466   :  { %1199 = vsyncadd [#allocation18], 4294966784 }
 0x467   :  { %677 = vsyncpa [#allocation3], 1 }
 0x468   :  { %678 = vsyncpa [#allocation6], 1 }
 0x469   :  { %679 = vsyncpa [#allocation9], 1 }
 0x46a   :  { %680 = vsyncpa [#allocation12], 1 }
 0x46b   :  { %681 = vsyncpa [#allocation15], 1 }
 0x46c   :  { %682 = vsyncpa [#allocation4], 1 }
 0x46d   :  { %683 = vsyncpa [#allocation18], 1 }

</bundles_post_ra>
